<compile_context>
chip_gen: v7x
topology: tpu7x:2x2x1
jax: 0.10.0
libtpu: 0.0.40
codegen_flags: <defaults>
</compile_context>

<pallas_src>
import jax
import jax.numpy as jnp
from jax.experimental import pallas as pl
from jax.experimental.pallas import tpu as pltpu


def _round_up(x, m):
    return ((x + m - 1) // m) * m


# ----------------------------------------------------------------------------
# Kernel: one batch tile per grid step.  Norms + (W2 @ Wq) already folded.
# ----------------------------------------------------------------------------
def critic_twin_kernel(s_ref, a_ref, w1s_ref, w1a_ref, b1_ref, w2q_ref, b2q_ref,
                       out_ref):
    # layer 0: state @ W1s + action @ W1a + b1, ReLU  (bf16 operands, f32 acc)
    s = s_ref[...].astype(jnp.bfloat16)
    a = a_ref[...].astype(jnp.bfloat16)
    h = jnp.dot(s, w1s_ref[...], preferred_element_type=jnp.float32)
    h = h + jnp.dot(a, w1a_ref[...], preferred_element_type=jnp.float32)
    h = jnp.maximum(h + b1_ref[...], 0.0)

    # folded enc_sa layer 1 + dec_q1 + value re-norm
    q = jnp.dot(h.astype(jnp.bfloat16), w2q_ref[...],
                preferred_element_type=jnp.float32)
    # TODO(synk): lane-dense repack of the (tb, A=4) q tile (e.g. to (tb//32, 128))
    # before the store would cut masked vst pressure further on v5e; skipped to
    # keep Mosaic lowering simple.
    out_ref[...] = (q + b2q_ref[...]).astype(out_ref.dtype)


# ----------------------------------------------------------------------------
# Parameter folding (all in f32):
#   state-norm   -> W1s / b1
#   W2 @ Wq      -> W2q / b2q
#   value re-norm-> W2q / b2q
# ----------------------------------------------------------------------------
def fold_params(p):
    std = jnp.maximum(p["state_std"], 1e-8)             # clamp: avoid inf on zero std
    w1s = p["w1s"] / std.T                               # [S, d0]
    b1 = p["b1"] - (p["state_avg"] / std) @ p["w1s"]     # [1, d0]
    wq_scaled = p["wq"] * p["value_std"]                 # [d1, A]
    w2q = p["w2"] @ wq_scaled                            # [d0, A]
    b2q = p["b2"] @ wq_scaled + p["bq"] * p["value_std"] + p["value_avg"]   # [1, A]
    return w1s, p["w1a"], b1, w2q, b2q


# ----------------------------------------------------------------------------
# Wrapper: dtype prep + batch-tiled pallas_call (no wrapper concat / pad).
# ----------------------------------------------------------------------------
def critic_twin_forward(state, action, params, *, block_batch=2048):
    B, S = state.shape
    A = action.shape[1]
    w1s, w1a, b1, w2q, b2q = fold_params(params)
    d0 = w1s.shape[1]
    Aout = w2q.shape[1]

    # bf16 matmul operands, f32 biases / inputs (inputs cast in-kernel).
    w1s = w1s.astype(jnp.bfloat16)
    w1a = w1a.astype(jnp.bfloat16)
    w2q = w2q.astype(jnp.bfloat16)
    b1 = b1.astype(jnp.float32)
    b2q = b2q.astype(jnp.float32)

    # Batch tile: multiple of 16 (bf16 sublane packing).  Prefer >= 2 grid steps
    # so the "parallel" axis can shard across v7x's two TensorCores.
    tb = min(_round_up(max(int(block_batch), 16), 16), _round_up(B, 16))
    if pl.cdiv(B, tb) < 2 and B > 16:
        tb = _round_up(pl.cdiv(B, 2), 16)
    grid = (pl.cdiv(B, tb),)

    flops = 2 * B * ((S + A) * d0 + d0 * Aout)
    bytes_accessed = (B * (S + A) * 4 + B * Aout * 4
                      + (w1s.size + w1a.size + w2q.size) * 2
                      + (b1.size + b2q.size) * 4)
    cost = pl.CostEstimate(flops=flops, transcendentals=0,
                           bytes_accessed=bytes_accessed)

    resident = lambda i: (0, 0)   # weights/biases: same block every step -> stay in VMEM
    out = pl.pallas_call(
        critic_twin_kernel,
        out_shape=jax.ShapeDtypeStruct((B, Aout), jnp.float32),
        grid_spec=pltpu.PrefetchScalarGridSpec(
            num_scalar_prefetch=0,
            grid=grid,
            in_specs=[
                pl.BlockSpec((tb, S), lambda i: (i, 0)),   # state batch tile (f32)
                pl.BlockSpec((tb, A), lambda i: (i, 0)),   # action batch tile (f32)
                pl.BlockSpec((S, d0), resident),           # W1s (state-norm folded)
                pl.BlockSpec((A, d0), resident),           # W1a
                pl.BlockSpec((1, d0), resident),           # b1
                pl.BlockSpec((d0, Aout), resident),        # W2q = W2 @ Wq (renorm folded)
                pl.BlockSpec((1, Aout), resident),         # b2q
            ],
            out_specs=pl.BlockSpec((tb, Aout), lambda i: (i, 0)),
        ),
        compiler_params=pltpu.CompilerParams(
            dimension_semantics=("parallel",),             # megacore split on v7x
            vmem_limit_bytes=32 * 1024 * 1024),            # big tiles still fit on v5e
        cost_estimate=cost,
    )(state.astype(jnp.float32), action.astype(jnp.float32),
      w1s, w1a, b1, w2q, b2q)
    return out


# ----------------------------------------------------------------------------
# Parameter construction (matches the PyTorch module's layout / init style).
# ----------------------------------------------------------------------------
def _orthogonal(key, rows, cols, gain):
    n = max(rows, cols)
    a = jax.random.normal(key, (n, n), dtype=jnp.float32)
    q, r = jnp.linalg.qr(a)
    q = q * jnp.sign(jnp.diag(r))[None, :]
    return gain * q[:rows, :cols]


def make_params(key, state_dim, action_dim, dims):
    d0, d1 = dims
    ks = jax.random.split(key, 6)
    in0 = state_dim + action_dim
    lim0 = 1.0 / jnp.sqrt(in0)
    w1 = jax.random.uniform(ks[0], (in0, d0), jnp.float32, -lim0, lim0)
    b1 = jax.random.uniform(ks[1], (1, d0), jnp.float32, -lim0, lim0)
    lim1 = 1.0 / jnp.sqrt(d0)
    w2 = jax.random.uniform(ks[2], (d0, d1), jnp.float32, -lim1, lim1)
    b2 = jax.random.uniform(ks[3], (1, d1), jnp.float32, -lim1, lim1)
    # dec_q1: orthogonal(std=0.5), bias = 1e-6 (PyTorch weight (out,in) -> transpose)
    wq = _orthogonal(ks[4], action_dim, d1, gain=0.5).T   # (d1, action_dim)
    bq = jnp.full((1, action_dim), 1e-6, jnp.float32)
    return {
        "state_avg": jnp.zeros((1, state_dim), jnp.float32),
        "state_std": jnp.ones((1, state_dim), jnp.float32),
        "value_avg": jnp.zeros((1, 1), jnp.float32),
        "value_std": jnp.ones((1, 1), jnp.float32),
        "w1s": w1[:state_dim, :],
        "w1a": w1[state_dim:, :],
        "b1": b1,
        "w2": w2,
        "b2": b2,
        "wq": wq,
        "bq": bq,
    }


# ----------------------------------------------------------------------------
# References: (a) original f32 semantics, (b) same folded/bf16 math as kernel.
# ----------------------------------------------------------------------------
def reference_forward(state, action, p):
    s = (state - p["state_avg"]) / p["state_std"]
    h = jnp.maximum(s @ p["w1s"] + action @ p["w1a"] + p["b1"], 0.0)
    h = h @ p["w2"] + p["b2"]
    q = h @ p["wq"] + p["bq"]
    return q * p["value_std"] + p["value_avg"]


def reference_forward_bf16(state, action, p):
    w1s, w1a, b1, w2q, b2q = fold_params(p)
    h = (jnp.dot(state.astype(jnp.bfloat16), w1s.astype(jnp.bfloat16),
                 preferred_element_type=jnp.float32)
         + jnp.dot(action.astype(jnp.bfloat16), w1a.astype(jnp.bfloat16),
                   preferred_element_type=jnp.float32)
         + b1)
    h = jnp.maximum(h, 0.0)
    q = jnp.dot(h.astype(jnp.bfloat16), w2q.astype(jnp.bfloat16),
                preferred_element_type=jnp.float32)
    return q + b2q


if __name__ == "__main__":
    # B=200 with block_batch=128 exercises a 2-step grid with a partial last tile
    # (implicit Pallas padding, no wrapper jnp.pad).
    B, state_dim, action_dim = 200, 12, 4
    dims = (32, 32)

    key = jax.random.PRNGKey(0)
    k_state, k_action, k_params = jax.random.split(key, 3)
    state = jax.random.normal(k_state, (B, state_dim), jnp.float32)
    action = jax.random.normal(k_action, (B, action_dim), jnp.float32)
    params = make_params(k_params, state_dim, action_dim, dims)

    out = critic_twin_forward(state, action, params, block_batch=128)
    out = jax.block_until_ready(out)
    assert out.shape == (B, action_dim)
    assert bool(jnp.all(jnp.isfinite(out)))

    # (a) exact-math check vs a jnp reference using the same folded bf16 pipeline
    ref_bf16 = reference_forward_bf16(state, action, params)
    assert jnp.allclose(out, ref_bf16, atol=5e-3, rtol=5e-3)

    # (b) semantic check vs the original full-f32 module math (bf16 tolerance)
    ref_f32 = reference_forward(state, action, params)
    assert jnp.allclose(out, ref_f32, atol=3e-2, rtol=3e-2)

    # Also check the default (large-tile) path on the same inputs.
    out2 = jax.block_until_ready(critic_twin_forward(state, action, params))
    assert jnp.allclose(out2, ref_f32, atol=3e-2, rtol=3e-2)

    print("KERNEL_OK")
</pallas_src>

<mosaic_0001>
module attributes {stable_mosaic.version = 11 : i64} {
  func.func @critic_twin_kernel(%arg0: i32, %arg1: memref<128x12xf32, #tpu.memory_space<vmem>>, %arg2: memref<128x4xf32, #tpu.memory_space<vmem>>, %arg3: memref<12x32xbf16, #tpu.memory_space<vmem>>, %arg4: memref<4x32xbf16, #tpu.memory_space<vmem>>, %arg5: memref<1x32xf32, #tpu.memory_space<vmem>>, %arg6: memref<32x4xbf16, #tpu.memory_space<vmem>>, %arg7: memref<1x4xf32, #tpu.memory_space<vmem>>, %arg8: memref<128x4xf32, #tpu.memory_space<vmem>>) attributes {dimension_semantics = [#tpu.dimension_semantics<parallel>], iteration_bounds = array<i64: 2>, scalar_prefetch = 0 : i64, scratch_operands = 0 : i64, tpu.core_type = #tpu.core_type<tc>, window_params = [{transform_indices = @transform_0, window_bounds = array<i64: 128, 12>}, {transform_indices = @transform_1, window_bounds = array<i64: 128, 4>}, {pipeline_mode = #tpu.pipeline_mode<synchronous>, transform_indices = @transform_2, window_bounds = array<i64: 12, 32>}, {pipeline_mode = #tpu.pipeline_mode<synchronous>, transform_indices = @transform_3, window_bounds = array<i64: 4, 32>}, {pipeline_mode = #tpu.pipeline_mode<synchronous>, transform_indices = @transform_4, window_bounds = array<i64: 1, 32>}, {pipeline_mode = #tpu.pipeline_mode<synchronous>, transform_indices = @transform_5, window_bounds = array<i64: 32, 4>}, {pipeline_mode = #tpu.pipeline_mode<synchronous>, transform_indices = @transform_6, window_bounds = array<i64: 1, 4>}, {transform_indices = @transform_7, window_bounds = array<i64: 128, 4>}]} {
    %c0 = arith.constant 0 : index
    %c0_0 = arith.constant 0 : index
    %0 = vector.load %arg1[%c0, %c0_0] : memref<128x12xf32, #tpu.memory_space<vmem>>, vector<128x12xf32>
    %1 = arith.truncf %0 : vector<128x12xf32> to vector<128x12xbf16>
    %c0_1 = arith.constant 0 : index
    %c0_2 = arith.constant 0 : index
    %2 = vector.load %arg2[%c0_1, %c0_2] : memref<128x4xf32, #tpu.memory_space<vmem>>, vector<128x4xf32>
    %3 = arith.truncf %2 : vector<128x4xf32> to vector<128x4xbf16>
    %c0_3 = arith.constant 0 : index
    %c0_4 = arith.constant 0 : index
    %4 = vector.load %arg3[%c0_3, %c0_4] : memref<12x32xbf16, #tpu.memory_space<vmem>>, vector<12x32xbf16>
    %cst = arith.constant dense<0.000000e+00> : vector<128x32xf32>
    %5 = tpu.matmul %1, %4, %cst {dimension_numbers = #tpu.dot_dimension_numbers<[1], [0], [0], [1], [0, 0, 1, 1], [], []>} : vector<128x12xbf16>, vector<12x32xbf16>, vector<128x32xf32> -> vector<128x32xf32>
    %c0_5 = arith.constant 0 : index
    %c0_6 = arith.constant 0 : index
    %6 = vector.load %arg4[%c0_5, %c0_6] : memref<4x32xbf16, #tpu.memory_space<vmem>>, vector<4x32xbf16>
    %cst_7 = arith.constant dense<0.000000e+00> : vector<128x32xf32>
    %7 = tpu.matmul %3, %6, %cst_7 {dimension_numbers = #tpu.dot_dimension_numbers<[1], [0], [0], [1], [0, 0, 1, 1], [], []>} : vector<128x4xbf16>, vector<4x32xbf16>, vector<128x32xf32> -> vector<128x32xf32>
    %8 = arith.addf %5, %7 : vector<128x32xf32>
    %c0_8 = arith.constant 0 : index
    %c0_9 = arith.constant 0 : index
    %9 = vector.load %arg5[%c0_8, %c0_9] : memref<1x32xf32, #tpu.memory_space<vmem>>, vector<1x32xf32>
    %10 = vector.broadcast %9 : vector<1x32xf32> to vector<128x32xf32>
    %11 = arith.addf %8, %10 : vector<128x32xf32>
    %cst_10 = arith.constant 0.000000e+00 : f32
    %12 = vector.broadcast %cst_10 : f32 to vector<128x32xf32>
    %13 = arith.maximumf %11, %12 : vector<128x32xf32>
    %14 = arith.truncf %13 : vector<128x32xf32> to vector<128x32xbf16>
    %c0_11 = arith.constant 0 : index
    %c0_12 = arith.constant 0 : index
    %15 = vector.load %arg6[%c0_11, %c0_12] : memref<32x4xbf16, #tpu.memory_space<vmem>>, vector<32x4xbf16>
    %cst_13 = arith.constant dense<0.000000e+00> : vector<128x4xf32>
    %16 = tpu.matmul %14, %15, %cst_13 {dimension_numbers = #tpu.dot_dimension_numbers<[1], [0], [0], [1], [0, 0, 1, 1], [], []>} : vector<128x32xbf16>, vector<32x4xbf16>, vector<128x4xf32> -> vector<128x4xf32>
    %c0_14 = arith.constant 0 : index
    %c0_15 = arith.constant 0 : index
    %17 = vector.load %arg7[%c0_14, %c0_15] : memref<1x4xf32, #tpu.memory_space<vmem>>, vector<1x4xf32>
    %18 = vector.broadcast %17 : vector<1x4xf32> to vector<128x4xf32>
    %19 = arith.addf %16, %18 : vector<128x4xf32>
    %c0_16 = arith.constant 0 : index
    %c0_17 = arith.constant 0 : index
    %20 = vector.load %arg8[%c0_16, %c0_17] : memref<128x4xf32, #tpu.memory_space<vmem>>, vector<128x4xf32>
    tpu.vector_store %arg8[%c0_16, %c0_17], %19 {strides = array<i32>} : memref<128x4xf32, #tpu.memory_space<vmem>>, vector<128x4xf32>,
    return
  }
  func.func @transform_0(%arg0: i32) -> (i32, i32) {
    %c0_i32 = arith.constant 0 : i32
    %c0_i32_0 = arith.constant 0 : i32
    return %arg0, %c0_i32 : i32, i32
  }
  func.func @transform_1(%arg0: i32) -> (i32, i32) {
    %c0_i32 = arith.constant 0 : i32
    %c0_i32_0 = arith.constant 0 : i32
    return %arg0, %c0_i32 : i32, i32
  }
  func.func @transform_2(%arg0: i32) -> (i32, i32) {
    %c0_i32 = arith.constant 0 : i32
    %c0_i32_0 = arith.constant 0 : i32
    %c0_i32_1 = arith.constant 0 : i32
    return %c0_i32, %c0_i32_0 : i32, i32
  }
  func.func @transform_3(%arg0: i32) -> (i32, i32) {
    %c0_i32 = arith.constant 0 : i32
    %c0_i32_0 = arith.constant 0 : i32
    %c0_i32_1 = arith.constant 0 : i32
    return %c0_i32, %c0_i32_0 : i32, i32
  }
  func.func @transform_4(%arg0: i32) -> (i32, i32) {
    %c0_i32 = arith.constant 0 : i32
    %c0_i32_0 = arith.constant 0 : i32
    %c0_i32_1 = arith.constant 0 : i32
    return %c0_i32, %c0_i32_0 : i32, i32
  }
  func.func @transform_5(%arg0: i32) -> (i32, i32) {
    %c0_i32 = arith.constant 0 : i32
    %c0_i32_0 = arith.constant 0 : i32
    %c0_i32_1 = arith.constant 0 : i32
    return %c0_i32, %c0_i32_0 : i32, i32
  }
  func.func @transform_6(%arg0: i32) -> (i32, i32) {
    %c0_i32 = arith.constant 0 : i32
    %c0_i32_0 = arith.constant 0 : i32
    %c0_i32_1 = arith.constant 0 : i32
    return %c0_i32, %c0_i32_0 : i32, i32
  }
  func.func @transform_7(%arg0: i32) -> (i32, i32) {
    %c0_i32 = arith.constant 0 : i32
    %c0_i32_0 = arith.constant 0 : i32
    return %arg0, %c0_i32 : i32, i32
  }
}

</mosaic_0001>

<bundles_post_ra>
// kernel: tpu_custom_call.1
= control target key start
LH: loop header
LB: loop body
LE: loop exit
PB: predicated region body
PF: predicated region fallthrough
CT: control target
= control target key end

     0   :  { %s1528_s24 = smov 0   ;;  %s1530_s25 = smov 0   ;;  %s1801_s0 = inlined_call_operand.vmem [shape: f32[200,12], index: 0, kind: input, shape index: {}]   ;;  %s1802_s1 = inlined_call_operand.vmem [shape: f32[200,4], index: 1, kind: input, shape index: {}]   ;;  %s1803_s2 = inlined_call_operand.vmem [shape: bf16[12,32], index: 2, kind: input, shape index: {}]   ;;  %s1804_s3 = inlined_call_operand.vmem [shape: bf16[4,32], index: 3, kind: input, shape index: {}]   ;;  %s1805_s4 = inlined_call_operand.vmem [shape: f32[1,32], index: 4, kind: input, shape index: {}]   ;;  %s1806_s5 = inlined_call_operand.vmem [shape: bf16[32,4], index: 5, kind: input, shape index: {}]   ;;  %s1807_s6 = inlined_call_operand.vmem [shape: f32[1,4], index: 6, kind: input, shape index: {}]   ;;  %s1808_s7 = inlined_call_operand.vmem [shape: f32[200,4], index: 7, kind: output, shape index: {}]  }
   0x1   :  { %s1532_s26 = smov 0  }
   0x2 LB: > { %s1541_s27 = sadd.s32 4294967295, %s1454_s26   ;;  %s1543_s28 = sadd.s32 1, %s1454_s26   ;;  %s1454_s26 = sphi %s1532_s26, %s1815_s26   ;;  %s1450_s25 = sphi %s1530_s25, %s1814_s25   ;;  %s1446_s24 = sphi %s1528_s24, %s1813_s24  }
   0x3   : > { %s178_s29 = ssub.s32 %s1454_s26, %s1543_s28  ;;  %s181_s30 = sadd.s32 1, %s1450_s25 }
   0x4   : > { %p179_p0 = scmp.eq.s32.totalorder %s178_s29, 0  ;;  %p191_p1 = scmp.ne.s32.totalorder %s1450_s25, %s1446_s24 }
   0x5   : > { %p192_p2 = scmp.eq.s32.totalorder %s1541_s27, 1  ;;  %p1149_p3 = scmp.ge.s32.totalorder %s1454_s26, 1 }
   0x6   : > { %s1551_s8 = scalar_select %p179_p0, %s1450_s25, %s181_s30  }
   0x7   : > { %p1553_p4 = por %p192_p2, %p191_p1  ;;  %p265_p5 = scmp.lt.s32.totalorder %s1454_s26, 3 }
   0x9   : > { %p266_p6 = pnand %p1149_p3, %p265_p5 }
   0xa   : > { %v393_v0 = vld [vmem:[%s1804_s3] sm:$0x3] (!%p266_p6)  ;;  %vm419_vm0 = vcmask (!%p266_p6), 1041408   ;;  %s1561_s12 = sshll.u32 (!%p266_p6), %s1541_s27, 4  ;;  %vm550_vm1 = vcmask (!%p266_p6), 1045504   ;;  %vm394_vm2 = vcmask (!%p266_p6), 31744  }
   0xb   : > { %269 = sbr.rel (%p266_p6) target bundleno = 557 (0x22d), region = 48  ;;  %1306 = vmatprep.subr.msk.bf16.mxu0 (!%p266_p6), %vm419_vm0, %v393_v0  ;;  %v421_v1 = vsel (!%p266_p6), %vm419_vm0, %v393_v0, 0  ;;  %p314_p7 = scmp.lt.s32.totalorder (!%p266_p6), %s1561_s12, 24  ;;  %1307 = vmatprep.subr.msk.bf16.mxu1 (!%p266_p6), %vm419_vm0, %v393_v0  ;;  %v1397_v2 = vld [vmem:[%s1803_s2] sm:$0x3f] (!%p266_p6)   ;;  %vm525_vm3 = vcmask (!%p266_p6), 97280  }
   0xc   : > { %1233 = vmatpush3.bf16.msra.mxu0 (!%p266_p6), %v421_v1  ;;  %1289 = vmatpush3.bf16.msra.mxu1 (!%p266_p6), %v421_v1  ;;  %v1398_v3 = vld [vmem:[%s1806_s5] sm:$0xff] (!%p266_p6)   ;;  %v552_v12 = vsel (!%p266_p6), %vm550_vm1, %v1397_v2, 0  ;;  %v1399_v53 = vld [vmem:[%s1806_s5 + $0x8] sm:$0xff] (!%p266_p6)   ;;  %vm721_vm4 = vcmask (!%p266_p6), 261120   ;;  %s306_s13 = sand.u32 (!%p266_p6), 1, %s1446_s24  }
   0xd   : > { %1308 = vmatprep.subr.msk.bf16.mxu0 (!%p266_p6), %vm550_vm1, %v1397_v2  ;;  %1268 = vmatprep.subr.bf16.mxu1 (!%p266_p6), %v1398_v3  ;;  %v1637_v59 = vld [vmem:[%s1805_s4] ss:$0 sm:$0xff] (!%p266_p6)  ;;  %s1150_s14 = sshll.u32 (!%p266_p6), %s306_s13, 7 }
  0x12   : > { %s315_s17 = scalar_select %p314_p7, %s1561_s12, 24 }
  0x13   : > { %s867_s24 = ssub.s32 (%p1553_p4), 25, %s1561_s12 }
  0x14   : > { %s1152_s18 = sshll.u32 %s315_s17, 3  ;;  %s1667_s17 = scalar_lea.vmem [#allocation2], %s1150_s14  }
  0x15   : > { %s1575_s21 = scalar_lea.vmem %s1802_s1, %s1152_s18  ;;  %s1586_s26 = scalar_lea.vmem %s1801_s0, %s1152_s18 }
  0x16   : > { %v367_v4 = vld [vmem:[%s1575_s21] sm:$0xff]  ;;  %v368_v5 = vld [vmem:[%s1575_s21 + $0x8] sm:$0xff]  ;;  %v369_v6 = vld [vmem:[%s1575_s21 + $0x10] sm:$0xff]  ;;  %s1201_s18 = sshll.u32 (%p1553_p4), %s1541_s27, 7  ;;  %p868_p8 = scmp.lt.s32.totalorder (%p1553_p4), %s867_s24, 16 }
  0x17   : > { %v383_v7 = vpack.c.bf16 %v368_v5, %v367_v4  ;;  %v370_v8 = vld [vmem:[%s1575_s21 + $0x18] sm:$0xff]  ;;  %v371_v9 = vld [vmem:[%s1575_s21 + $0x20] sm:$0xff]  ;;  %v372_v10 = vld [vmem:[%s1575_s21 + $0x28] sm:$0xff] }
  0x18   : > { %v384_v11 = vpack.c.bf16 %v370_v8, %v369_v6  ;;  %v385_v13 = vpack.c.bf16 %v372_v10, %v371_v9  ;;  %v373_v14 = vld [vmem:[%s1575_s21 + $0x30] sm:$0xff]  ;;  %v374_v15 = vld [vmem:[%s1575_s21 + $0x38] sm:$0xff]  ;;  %v343_v16 = vld [vmem:[%s1586_s26] sm:$0xff] }
  0x19   : > { %1234 = vmatprep.mubr.msk.bf16.mxu0 %vm394_vm2, %v383_v7  ;;  %v375_v17 = vld [vmem:[%s1575_s21 + $0x40] sm:$0xff]  ;;  %v376_v18 = vld [vmem:[%s1575_s21 + $0x48] sm:$0xff]  ;;  %v377_v21 = vld [vmem:[%s1575_s21 + $0x50] sm:$0xff]  ;;  %v386_v24 = vpack.c.bf16 %v374_v15, %v373_v14 }
  0x1a   : > { %1235 = vmatmul.mubr.msk.bf16.vlgmr.msra.gmra.mrb[0].mxu0 %vm394_vm2, %v384_v11  ;;  %v344_v19 = vld [vmem:[%s1586_s26 + $0x8] sm:$0xff]  ;;  %v387_v20 = vpack.c.bf16 %v376_v18, %v375_v17  ;;  %v378_v22 = vld [vmem:[%s1575_s21 + $0x58] sm:$0xff]  ;;  %v379_v25 = vld [vmem:[%s1575_s21 + $0x60] sm:$0xff] }
  0x1b   : > { %1251 = vmatpush3.bf16.msra.mxu0 %v552_v12  ;;  %1238 = vmatprep.mubr.msk.bf16.mxu0 %vm394_vm2, %v385_v13  ;;  %v388_v23 = vpack.c.bf16 %v378_v22, %v377_v21  ;;  %v380_v26 = vld [vmem:[%s1575_s21 + $0x68] sm:$0xff]  ;;  %v359_v27 = vpack.c.bf16 %v344_v19, %v343_v16  ;;  %v381_v29 = vld [vmem:[%s1575_s21 + $0x70] sm:$0xff]  ;;  %v382_v30 = vld [vmem:[%s1575_s21 + $0x78] sm:$0xff]  ;;  %s1708_s21 = scalar_lea.vmem (%p1553_p4), %s1808_s7, %s1201_s18  }
  0x1c   : > { %1242 = vmatprep.mubr.msk.bf16.mxu1 %vm394_vm2, %v387_v20  ;;  %v389_v28 = vpack.c.bf16 %v380_v26, %v379_v25  ;;  %v345_v31 = vld [vmem:[%s1586_s26 + $0x10] sm:$0xff]  ;;  %v346_v32 = vld [vmem:[%s1586_s26 + $0x18] sm:$0xff]  ;;  %v390_v33 = vpack.c.bf16 %v382_v30, %v381_v29  ;;  %v347_v34 = vld [vmem:[%s1586_s26 + $0x20] sm:$0xff] }
  0x1d   : > { %1243 = vmatmul.mubr.msk.bf16.vlgmr.msra.gmra.mrb[0].mxu1 %vm394_vm2, %v388_v23  ;;  %v348_v35 = vld [vmem:[%s1586_s26 + $0x28] sm:$0xff]  ;;  %v360_v36 = vpack.c.bf16 %v346_v32, %v345_v31  ;;  %v349_v38 = vld [vmem:[%s1586_s26 + $0x30] sm:$0xff]  ;;  %v350_v39 = vld [vmem:[%s1586_s26 + $0x38] sm:$0xff] }
  0x1e   : > { %1269 = vmatpush3.bf16.msra.mxu1 %v1398_v3  ;;  %1246 = vmatprep.mubr.msk.bf16.mxu1 %vm394_vm2, %v389_v28  ;;  %v361_v37 = vpack.c.bf16 %v348_v35, %v347_v34  ;;  %v351_v40 = vld [vmem:[%s1586_s26 + $0x40] sm:$0xff]  ;;  %v352_v41 = vld [vmem:[%s1586_s26 + $0x48] sm:$0xff]  ;;  %v362_v42 = vpack.c.bf16 %v350_v39, %v349_v38  ;;  %v353_v44 = vld [vmem:[%s1586_s26 + $0x50] sm:$0xff] }
  0x1f   : > { %v363_v43 = vpack.c.bf16 %v352_v41, %v351_v40  ;;  %v354_v45 = vld [vmem:[%s1586_s26 + $0x58] sm:$0xff]  ;;  %v355_v46 = vld [vmem:[%s1586_s26 + $0x60] sm:$0xff]  ;;  %v356_v47 = vld [vmem:[%s1586_s26 + $0x68] sm:$0xff]  ;;  %1270 = vmatprep.subr.bf16.mxu1 %v1399_v53 }
  0x20   : > { %v364_v48 = vpack.c.bf16 %v354_v45, %v353_v44  ;;  %v365_v49 = vpack.c.bf16 %v356_v47, %v355_v46  ;;  %v357_v50 = vld [vmem:[%s1586_s26 + $0x70] sm:$0xff]  ;;  %v358_v51 = vld [vmem:[%s1586_s26 + $0x78] sm:$0xff] }
  0x21   : > { %v366_v52 = vpack.c.bf16 %v358_v51, %v357_v50 }
  0x22   : > { %1239 = vmatmul.mubr.msk.bf16.gmra.mrb[4].mxu0 %vm394_vm2, %v386_v24  ;;  %1271 = vmatpush3.bf16.msra.mxu1 %v1399_v53 }
  0x23   : > { %1252 = vmatprep.mubr.msk.bf16.mxu0 %vm525_vm3, %v359_v27 }
  0x25   : > { %1247 = vmatmul.mubr.msk.bf16.gmra.mrb[4].mxu1 %vm394_vm2, %v390_v33 }
  0x2a   : > { %1253 = vmatmul.mubr.msk.bf16.vlgmr.msra.gmra.mrb[0].mxu0 %vm525_vm3, %v360_v36 }
  0x2b   : > { %1256 = vmatprep.mubr.msk.bf16.mxu0 %vm525_vm3, %v361_v37 }
  0x32   : > { %1257 = vmatmul.mubr.msk.bf16.gmra.mrb[4].mxu0 %vm525_vm3, %v362_v42 }
  0x33   : > { %1260 = vmatprep.mubr.msk.bf16.mxu0 %vm525_vm3, %v363_v43 }
  0x3a   : > { %1261 = vmatmul.mubr.msk.bf16.gmra.mrb[8].mxu0 %vm525_vm3, %v364_v48 }
  0x3b   : > { %1264 = vmatprep.mubr.msk.bf16.mxu0 %vm525_vm3, %v365_v49 }
  0x42   : > { %1265 = vmatmul.mubr.msk.bf16.gmra.mrb[12].mxu0 %vm525_vm3, %v366_v52 }
  0xf0   : > { %v1244_v54 = vpop.f32.mrb[0].mxu1 }
  0xf1   : > { %v489_v55 = vpop.f32.mrb[1].mxu1 }
  0xf2   : > { %v1245_v56 = vpop.f32.mrb[2].mxu1 }
  0xf3   : > { %v492_v57 = vpop.f32.mrb[3].mxu1 }
  0xf8   : > { %v1248_v58 = vpop.f32.mrb[4].mxu1 }
  0xf9   : > { %v505_v60 = vpop.f32.mrb[5].mxu1 }
  0xfa   : > { %v1249_v61 = vpop.f32.mrb[6].mxu1 }
  0xfb   : > { %v508_v63 = vpop.f32.mrb[7].mxu1 }
  0xfd   : > { %v1254_v62 = vpop.f32.mrb[0].mxu0 }
  0xfe   : > { %v660_v0 = vadd.f32 %v1254_v62, %v1637_v59  ;;  %v588_v1 = vpop.f32.mrb[1].mxu0 }
  0xff   : > { %v658_v2 = vadd.f32 %v1637_v59, %v588_v1  ;;  %v1255_v3 = vpop.f32.mrb[2].mxu0 }
 0x100   : > { %v661_v4 = vadd.f32 %v1255_v3, %v1637_v59  ;;  %v591_v5 = vpop.f32.mrb[3].mxu0  ;;  %v676_v7 = vmax.f32 %v660_v0, 0.0 }
 0x101   : > { %v659_v6 = vadd.f32 %v1637_v59, %v591_v5  ;;  %v674_v9 = vmax.f32 %v658_v2, 0.0 }
 0x102   : > { %v677_v8 = vmax.f32 %v661_v4, 0.0 }
 0x103   : > { %v675_v10 = vmax.f32 %v659_v6, 0.0 }
 0x104   : > { %v691_v11 = vpack.c.bf16 %v677_v8, %v676_v7 }
 0x105   : > { %v690_v12 = vpack.c.bf16 %v675_v10, %v674_v9  ;;  %v1258_v13 = vpop.f32.mrb[4].mxu0 }
 0x106   : > { %v664_v14 = vadd.f32 %v1258_v13, %v1637_v59  ;;  %v604_v15 = vpop.f32.mrb[5].mxu0 }
 0x107   : > { %v662_v16 = vadd.f32 %v1637_v59, %v604_v15  ;;  %v1259_v17 = vpop.f32.mrb[6].mxu0  ;;  %1272 = vmatprep.mubr.msk.bf16.mxu1 %vm721_vm4, %v690_v12 }
 0x108   : > { %v665_v18 = vadd.f32 %v1259_v17, %v1637_v59  ;;  %v607_v19 = vpop.f32.mrb[7].mxu0  ;;  %1273 = vmatmul.mubr.msk.bf16.vlgmr.msra.gmra.mrb[8].mxu1 %vm721_vm4, %v691_v11  ;;  %v680_v21 = vmax.f32 %v664_v14, 0.0 }
 0x109   : > { %v663_v20 = vadd.f32 %v1637_v59, %v607_v19  ;;  %v678_v23 = vmax.f32 %v662_v16, 0.0 }
 0x10a   : > { %v681_v22 = vmax.f32 %v665_v18, 0.0 }
 0x10b   : > { %v679_v24 = vmax.f32 %v663_v20, 0.0 }
 0x10c   : > { %v693_v25 = vpack.c.bf16 %v681_v22, %v680_v21 }
 0x10d   : > { %v692_v26 = vpack.c.bf16 %v679_v24, %v678_v23  ;;  %v1262_v27 = vpop.f32.mrb[8].mxu0 }
 0x10e   : > { %v629_v28 = vadd.f32 %v1262_v27, %v1244_v54  ;;  %v620_v29 = vpop.f32.mrb[9].mxu0 }
 0x10f   : > { %v621_v30 = vadd.f32 %v620_v29, %v489_v55  ;;  %v1263_v31 = vpop.f32.mrb[10].mxu0  ;;  %1276 = vmatprep.mubr.msk.bf16.mxu1 %vm721_vm4, %v692_v26 }
 0x110   : > { %v668_v32 = vadd.f32 %v1637_v59, %v629_v28  ;;  %v632_v33 = vadd.f32 %v1263_v31, %v1245_v56  ;;  %v623_v34 = vpop.f32.mrb[11].mxu0  ;;  %1277 = vmatmul.mubr.msk.bf16.gmra.mrb[12].mxu1 %vm721_vm4, %v693_v25 }
 0x111   : > { %v666_v35 = vadd.f32 %v1637_v59, %v621_v30  ;;  %v624_v36 = vadd.f32 %v623_v34, %v492_v57 }
 0x112   : > { %v669_v37 = vadd.f32 %v1637_v59, %v632_v33  ;;  %v684_v39 = vmax.f32 %v668_v32, 0.0 }
 0x113   : > { %v667_v38 = vadd.f32 %v1637_v59, %v624_v36  ;;  %v682_v41 = vmax.f32 %v666_v35, 0.0 }
 0x114   : > { %v685_v40 = vmax.f32 %v669_v37, 0.0 }
 0x115   : > { %v683_v42 = vmax.f32 %v667_v38, 0.0  ;;  %v1266_v43 = vpop.f32.mrb[12].mxu0 }
 0x116   : > { %v695_v44 = vpack.c.bf16 %v685_v40, %v684_v39  ;;  %v645_v45 = vadd.f32 %v1266_v43, %v1248_v58  ;;  %v636_v46 = vpop.f32.mrb[13].mxu0 }
 0x117   : > { %v694_v47 = vpack.c.bf16 %v683_v42, %v682_v41  ;;  %v637_v48 = vadd.f32 %v636_v46, %v505_v60  ;;  %v1267_v49 = vpop.f32.mrb[14].mxu0 }
 0x118   : > { %v672_v50 = vadd.f32 %v1637_v59, %v645_v45  ;;  %v648_v51 = vadd.f32 %v1267_v49, %v1249_v61  ;;  %v639_v52 = vpop.f32.mrb[15].mxu0  ;;  %v1173_v61 = vld [vmem:[%s1807_s6] ss:$0 sm:$0xff] }
 0x119   : > { %v670_v53 = vadd.f32 %v1637_v59, %v637_v48  ;;  %v640_v54 = vadd.f32 %v639_v52, %v508_v63  ;;  %1280 = vmatprep.mubr.msk.bf16.mxu1 %vm721_vm4, %v694_v47 }
 0x11a   : > { %v673_v55 = vadd.f32 %v1637_v59, %v648_v51  ;;  %1281 = vmatmul.mubr.msk.bf16.gmra.mrb[16].mxu1 %vm721_vm4, %v695_v44  ;;  %v688_v57 = vmax.f32 %v672_v50, 0.0 }
 0x11b   : > { %v671_v56 = vadd.f32 %v1637_v59, %v640_v54  ;;  %v686_v60 = vmax.f32 %v670_v53, 0.0 }
 0x11c   : > { %v689_v58 = vmax.f32 %v673_v55, 0.0 }
 0x11d   : > { %v687_v62 = vmax.f32 %v671_v56, 0.0 }
 0x11e   : > { %v697_v0 = vpack.c.bf16 %v689_v58, %v688_v57 }
 0x11f   : > { %v696_v1 = vpack.c.bf16 %v687_v62, %v686_v60 }
 0x121   : > { %1284 = vmatprep.mubr.msk.bf16.mxu1 %vm721_vm4, %v696_v1 }
 0x122   : > { %1285 = vmatmul.mubr.msk.bf16.gmra.mrb[20].mxu1 %vm721_vm4, %v697_v0 }
 0x1db   : > { %v1274_v63 = vpop.f32.mrb[8].mxu1 }
 0x1dc   : > { %v789_v2 = vadd.f32 %v1274_v63, %v1173_v61  ;;  %v780_v3 = vpop.f32.mrb[9].mxu1 }
 0x1dd   : > { %v781_v59 = vadd.f32 %v1173_v61, %v780_v3  ;;  %v1275_v4 = vpop.f32.mrb[10].mxu1 }
 0x1de   : > { %845 = vst.msk [vmem:[%s1667_s17 + $0x10] sm:$0xff] %vm394_vm2, %v789_v2  ;;  %v792_v5 = vadd.f32 %v1275_v4, %v1173_v61  ;;  %v783_v6 = vpop.f32.mrb[11].mxu1 }
 0x1df   : > { %843 = vst.msk [vmem:[%s1667_s17] sm:$0xff] %vm394_vm2, %v781_v59  ;;  %v784_v7 = vadd.f32 %v1173_v61, %v783_v6 }
 0x1e0   : > { %846 = vst.msk [vmem:[%s1667_s17 + $0x18] sm:$0xff] %vm394_vm2, %v792_v5 }
 0x1e1   : > { %844 = vst.msk [vmem:[%s1667_s17 + $0x8] sm:$0xff] %vm394_vm2, %v784_v7 }
 0x1e3   : > { %v1278_v8 = vpop.f32.mrb[12].mxu1 }
 0x1e4   : > { %v805_v9 = vadd.f32 %v1278_v8, %v1173_v61  ;;  %v796_v10 = vpop.f32.mrb[13].mxu1 }
 0x1e5   : > { %v797_v11 = vadd.f32 %v1173_v61, %v796_v10  ;;  %v1279_v12 = vpop.f32.mrb[14].mxu1 }
 0x1e6   : > { %849 = vst.msk [vmem:[%s1667_s17 + $0x30] sm:$0xff] %vm394_vm2, %v805_v9  ;;  %v808_v13 = vadd.f32 %v1279_v12, %v1173_v61  ;;  %v799_v14 = vpop.f32.mrb[15].mxu1 }
 0x1e7   : > { %847 = vst.msk [vmem:[%s1667_s17 + $0x20] sm:$0xff] %vm394_vm2, %v797_v11  ;;  %v800_v15 = vadd.f32 %v1173_v61, %v799_v14 }
 0x1e8   : > { %850 = vst.msk [vmem:[%s1667_s17 + $0x38] sm:$0xff] %vm394_vm2, %v808_v13 }
 0x1e9   : > { %848 = vst.msk [vmem:[%s1667_s17 + $0x28] sm:$0xff] %vm394_vm2, %v800_v15 }
 0x1ed   : > { %v1282_v16 = vpop.f32.mrb[16].mxu1 }
 0x1ee   : > { %v821_v17 = vadd.f32 %v1282_v16, %v1173_v61  ;;  %v812_v18 = vpop.f32.mrb[17].mxu1 }
 0x1ef   : > { %v813_v19 = vadd.f32 %v1173_v61, %v812_v18  ;;  %v1283_v20 = vpop.f32.mrb[18].mxu1 }
 0x1f0   : > { %853 = vst.msk [vmem:[%s1667_s17 + $0x50] sm:$0xff] %vm394_vm2, %v821_v17  ;;  %v824_v21 = vadd.f32 %v1283_v20, %v1173_v61  ;;  %v815_v22 = vpop.f32.mrb[19].mxu1 }
 0x1f1   : > { %851 = vst.msk [vmem:[%s1667_s17 + $0x40] sm:$0xff] %vm394_vm2, %v813_v19  ;;  %v816_v23 = vadd.f32 %v1173_v61, %v815_v22 }
 0x1f2   : > { %854 = vst.msk [vmem:[%s1667_s17 + $0x58] sm:$0xff] %vm394_vm2, %v824_v21 }
 0x1f3   : > { %852 = vst.msk [vmem:[%s1667_s17 + $0x48] sm:$0xff] %vm394_vm2, %v816_v23 }
 0x1f5   : > { %v1286_v24 = vpop.f32.mrb[20].mxu1  ;;  %865 = sbr.rel (!%p1553_p4) target bundleno = 557 (0x22d), region = 52 }
 0x1f6   : > { %v837_v25 = vadd.f32 %v1286_v24, %v1173_v61  ;;  %v828_v26 = vpop.f32.mrb[21].mxu1 }
 0x1f7   : > { %v829_v27 = vadd.f32 %v1173_v61, %v828_v26  ;;  %v1287_v28 = vpop.f32.mrb[22].mxu1 }
 0x1f8   : > { %857 = vst.msk [vmem:[%s1667_s17 + $0x70] sm:$0xff] %vm394_vm2, %v837_v25  ;;  %v840_v29 = vadd.f32 %v1287_v28, %v1173_v61  ;;  %v831_v30 = vpop.f32.mrb[23].mxu1 }
 0x1f9   : > { %855 = vst.msk [vmem:[%s1667_s17 + $0x60] sm:$0xff] %vm394_vm2, %v829_v27  ;;  %v832_v31 = vadd.f32 %v1173_v61, %v831_v30 }
 0x1fa   : > { %858 = vst.msk [vmem:[%s1667_s17 + $0x78] sm:$0xff] %vm394_vm2, %v840_v29 }
 0x1fb   : > { %856 = vst.msk [vmem:[%s1667_s17 + $0x68] sm:$0xff] %vm394_vm2, %v832_v31 }
 0x1fc   : > { %s1817_s24 = smov (!%p868_p8, %s867_s24), 16 }
 0x1fd   : > { %s1186_s22 = sshll.u32 %s1817_s24, 7 }
 0x1fe   : > { %p1189_p9 = scmp.eq.s32.totalorder %s1186_s22, 0 }
 0x1ff   : > { %s1714_s23 = sshrl.u32 (!%p1189_p9), %s1817_s24, 4 }
 0x200   : > { %876 = sbr.rel (%p1189_p9) target bundleno = 557 (0x22d), region = 56  ;;  %p1190_p10 = scmp.le.s32.totalorder (!%p1189_p9), %s1714_s23, 0 }
 0x207   : > { %1096 = sbr.rel (%p1190_p10) target bundleno = 536 (0x218), region = 135  ;;  %s1810_s27 = smov (!%p1190_p10), %s1708_s21 }
 0x208   : > { %s1811_s9 = smov (!%p1190_p10), %s1667_s17  ;;  %s1723_s12 = smov (!%p1190_p10), 0  }
 0x209   : > { %s1725_s26 = smov (!%p1190_p10), 0  }
 0x20e LB: >> { %v968_v32 = vld [vmem:[%s1462_s9] sm:$0xff]  ;;  %v970_v33 = vld [vmem:[%s1462_s9 + $0x8] sm:$0xff]  ;;  %v972_v34 = vld [vmem:[%s1462_s9 + $0x10] sm:$0xff]  ;;  %s1000_s29 = sadd.s32 1, %s1466_s12  ;;  %s962_s26 = sadd.s32 1, %s1470_s26   ;;  %s1470_s26 = sphi %s1725_s26, %s962_s26   ;;  %s1466_s12 = sphi %s1723_s12, %s1812_s12   ;;  %s1462_s9 = sphi %s1811_s9, %s1005_s9   ;;  %s1458_s27 = sphi %s1810_s27, %s1006_s27  }
 0x20f   : >> { %969 = vst [vmem:[%s1458_s27] sm:$0xff] %v968_v32  ;;  %971 = vst [vmem:[%s1458_s27 + $0x8] sm:$0xff] %v970_v33  ;;  %v974_v35 = vld [vmem:[%s1462_s9 + $0x18] sm:$0xff]  ;;  %v976_v36 = vld [vmem:[%s1462_s9 + $0x20] sm:$0xff]  ;;  %p1001_p11 = scmp.ge.s32.totalorder %s1000_s29, %s1714_s23  ;;  %p961_p12 = scmp.ge.s32.totalorder %s962_s26, %s1714_s23 }
 0x210   : >> { %973 = vst [vmem:[%s1458_s27 + $0x10] sm:$0xff] %v972_v34  ;;  %v978_v37 = vld [vmem:[%s1462_s9 + $0x28] sm:$0xff]  ;;  %975 = vst [vmem:[%s1458_s27 + $0x18] sm:$0xff] %v974_v35  ;;  %v980_v38 = vld [vmem:[%s1462_s9 + $0x30] sm:$0xff] }
 0x211   : >> { %977 = vst [vmem:[%s1458_s27 + $0x20] sm:$0xff] %v976_v36  ;;  %979 = vst [vmem:[%s1458_s27 + $0x28] sm:$0xff] %v978_v37  ;;  %v982_v39 = vld [vmem:[%s1462_s9 + $0x38] sm:$0xff]  ;;  %v984_v40 = vld [vmem:[%s1462_s9 + $0x40] sm:$0xff]  ;;  %s1819_s29 = smov (%p1001_p11, %s1000_s29), 0  ;;  %964 = sbr.rel (!%p961_p12) target bundleno = 526 (0x20e), region = 141 }
 0x212   : >> { %981 = vst [vmem:[%s1458_s27 + $0x30] sm:$0xff] %v980_v38  ;;  %983 = vst [vmem:[%s1458_s27 + $0x38] sm:$0xff] %v982_v39  ;;  %v986_v41 = vld [vmem:[%s1462_s9 + $0x48] sm:$0xff]  ;;  %v988_v42 = vld [vmem:[%s1462_s9 + $0x50] sm:$0xff]  ;;  %s1191_s30 = sshll.u32 %s1819_s29, 7  ;;  %s1812_s12 = smov %s1819_s29 }
 0x213   : >> { %985 = vst [vmem:[%s1458_s27 + $0x40] sm:$0xff] %v984_v40  ;;  %v990_v43 = vld [vmem:[%s1462_s9 + $0x58] sm:$0xff]  ;;  %987 = vst [vmem:[%s1458_s27 + $0x48] sm:$0xff] %v986_v41  ;;  %v992_v44 = vld [vmem:[%s1462_s9 + $0x60] sm:$0xff] }
 0x214   : >> { %989 = vst [vmem:[%s1458_s27 + $0x50] sm:$0xff] %v988_v42  ;;  %991 = vst [vmem:[%s1458_s27 + $0x58] sm:$0xff] %v990_v43  ;;  %v994_v45 = vld [vmem:[%s1462_s9 + $0x68] sm:$0xff]  ;;  %v996_v46 = vld [vmem:[%s1462_s9 + $0x70] sm:$0xff] }
 0x215   : >> { %993 = vst [vmem:[%s1458_s27 + $0x60] sm:$0xff] %v992_v44  ;;  %995 = vst [vmem:[%s1458_s27 + $0x68] sm:$0xff] %v994_v45  ;;  %v998_v47 = vld [vmem:[%s1462_s9 + $0x78] sm:$0xff]  ;;  %s1005_s9 = scalar_lea.vmem %s1667_s17, %s1191_s30 [#allocation2]  }
 0x216   : >> { %997 = vst [vmem:[%s1458_s27 + $0x70] sm:$0xff] %v996_v46  ;;  %999 = vst [vmem:[%s1458_s27 + $0x78] sm:$0xff] %v998_v47  ;;  %s1006_s27 = scalar_lea.vmem %s1708_s21, %s1191_s30  }
 0x218 PF: > { %s1783_s10 = sand.u32 15, %s1817_s24   ;;  %s1202_s11 = sshll.u32 %s1714_s23, 7 }
 0x219   : > { %s1011_s13 = scalar_lea.vmem %s1667_s17, %s1202_s11 [#allocation2]   ;;  %s1013_s14 = scalar_lea.vmem %s1708_s21, %s1202_s11  }
 0x21a   : > { %p1196_p13 = scmp.le.s32.totalorder %s1783_s10, 0 }
 0x21b   : > { %s1472_s15 = smov (!%p1196_p13), %s1013_s14   ;;  %s1476_s16 = smov (!%p1196_p13), %s1011_s13  }
 0x21c   : > { %1110 = sbr.rel (%p1196_p13) target bundleno = 557 (0x22d), region = 146  ;;  %s1480_s18 = smov (!%p1196_p13), 0  }
 0x21d   : > { %s1484_s19 = smov (!%p1196_p13), 0  }
 0x223 LB: >> { %v1023_v48 = vld [vmem:[%s1478_s16] sm:$0xff]  ;;  %s1025_s24 = sadd.s32 1, %s1482_s18  ;;  %s1017_s19 = sadd.s32 1, %s1486_s19   ;;  %s1486_s19 = sphi %s1484_s19, %s1017_s19   ;;  %s1482_s18 = sphi %s1480_s18, %s1481_s18   ;;  %s1478_s16 = sphi %s1476_s16, %s1030_s16   ;;  %s1474_s15 = sphi %s1472_s15, %s1031_s15  }
 0x224   : >> { %1024 = vst [vmem:[%s1474_s15] sm:$0xff] %v1023_v48  ;;  %p1026_p0 = scmp.ge.s32.totalorder %s1025_s24, %s1783_s10  ;;  %p1016_p1 = scmp.ge.s32.totalorder %s1017_s19, %s1783_s10 }
 0x226   : >> { %s1821_s24 = smov (%p1026_p0, %s1025_s24), 0  ;;  %1019 = sbr.rel (!%p1016_p1) target bundleno = 547 (0x223), region = 152 }
 0x227   : >> { %s1197_s17 = sshll.u32 %s1821_s24, 3  ;;  %s1481_s18 = smov %s1821_s24  }
 0x228   : >> { %s1030_s16 = scalar_lea.vmem %s1011_s13, %s1197_s17 [#allocation2]   ;;  %s1031_s15 = scalar_lea.vmem %s1013_s14, %s1197_s17  }
 0x22d PF: > { %p14_p2 = scmp.ge.s32.totalorder %s1543_s28, 4   ;;  %s1813_s24 = smov %s1450_s25 }
 0x22e   : > { %s1814_s25 = smov %s1551_s8  ;;  %s1815_s26 = smov %s1543_s28 }
 0x22f   :  { %16 = sbr.rel (!%p14_p2) target bundleno = 2 (0x2), region = 163 }

</bundles_post_ra>
